<compile_context>
chip_gen: v6e
topology: v6e:2x2x1
jax: 0.10.0
libtpu: 0.0.40
codegen_flags: <defaults>
</compile_context>

<pallas_src>
import functools

import jax
import jax.numpy as jnp
from jax import lax
from jax.experimental import pallas as pl
from jax.experimental.pallas import tpu as pltpu

HIDDEN_SIZE = 64
INPUT_SIZE = 1
NUM_CLASSES = 2
NUM_LAYERS = 1  # module hardcodes a single recurrent layer

LANE = 128
SUBLANE = 8


def _round_up(x, m):
    return ((x + m - 1) // m) * m


def _pick_time_chunk(t, cap=32):
    """Largest divisor of t that is <= cap (keeps chunks exact, no masking)."""
    if t <= cap:
        return t
    for c in range(cap, 0, -1):
        if t % c == 0:
            return c
    return 1


def _lstm_kernel(xproj_ref, whh_ref, wfc_ref, bfc_ref, out_ref, h_ref, c_ref,
                 *, t_chunk, hidden, unroll):
    """One (batch_tile, time_chunk) grid step of the LSTM recurrence.

    xproj_ref : (Tt, BT, 4*H) bf16  x @ W_ih^T + b, gate order [i, f, o, g]
    whh_ref   : (H, 4*H)      bf16  hidden->gates weights (same gate layout)
    wfc_ref   : (H, CP)       f32   fc weight, lane-padded output width
    bfc_ref   : (1, CP)       f32   fc bias, lane-padded
    out_ref   : (BT, CP)      f32   written on the last time chunk only
    h_ref/c_ref : (BT, H)     f32   carry across time chunks (VMEM scratch)
    """
    t_idx = pl.program_id(1)

    @pl.when(t_idx == 0)
    def _():
        h_ref[...] = jnp.zeros_like(h_ref)
        c_ref[...] = jnp.zeros_like(c_ref)

    whh = whh_ref[...]  # (H, 4H) bf16, loop-invariant (8 vregs)

    def step(s, carry):
        h, c = carry
        # Serial critical path per step: one bf16 MXU matmul + one VPU add.
        gates = xproj_ref[s].astype(jnp.float32) + jnp.dot(
            h.astype(jnp.bfloat16), whh, preferred_element_type=jnp.float32)
        # Gate order [i, f, o, g]: one sigmoid over the first 3*H lanes,
        # one tanh over the last H.
        sig = jax.nn.sigmoid(gates[:, : 3 * hidden])
        i_g = sig[:, 0 * hidden:1 * hidden]
        f_g = sig[:, 1 * hidden:2 * hidden]
        o_g = sig[:, 2 * hidden:3 * hidden]
        g_g = jnp.tanh(gates[:, 3 * hidden:])
        c_new = f_g * c + i_g * g_g
        h_new = o_g * jnp.tanh(c_new)
        return h_new, c_new

    # t_chunk is a Python static (derived from shapes), so unroll is legal.
    h_last, c_last = lax.fori_loop(0, t_chunk, step, (h_ref[...], c_ref[...]),
                                   unroll=unroll)
    h_ref[...] = h_last
    c_ref[...] = c_last

    @pl.when(t_idx == pl.num_programs(1) - 1)
    def _():
        # fc(out[:, -1, :]) -> lane-dense (BT, CP) store.
        out_ref[...] = (jnp.dot(h_last, wfc_ref[...],
                                preferred_element_type=jnp.float32)
                        + bfc_ref[...])


@jax.jit
def lstm_forward(x, w_ih, w_hh, b_ih, b_hh, w_fc, b_fc):
    """x: (B, T, I) float32. Returns (B, num_classes) float32."""
    B, T, I = x.shape
    H = w_hh.shape[1]
    C = w_fc.shape[0]

    CP = _round_up(C, LANE)                 # lane-dense output width
    # Batch tiling: sublane-padded, one "parallel" grid axis of batch tiles.
    # (For large batches with a bf16 LHS, rounding tiles to 16 rows would fill
    # packed sublanes; kept at 8 here since B is tiny.)
    BT = min(_round_up(B, SUBLANE), 64)
    BP = _round_up(B, BT)
    nb = BP // BT
    # Time streaming: chunk size is a divisor of T (no masking needed).
    Tt = _pick_time_chunk(T, cap=32)
    nt = T // Tt

    # PyTorch gate order [i, f, g, o] -> [i, f, o, g].
    reord = jnp.array([0, 1, 3, 2])
    w_ih_r = w_ih.reshape(4, H, I)[reord].astype(jnp.float32)      # (4, H, I)
    w_hh_r = w_hh.reshape(4, H, H)[reord].astype(jnp.float32)      # (4, Ho, Hi)
    b_r = (b_ih + b_hh).reshape(4, H)[reord].astype(jnp.float32)   # (4, H)

    # Hoisted input projection (+ fused bias), built directly in (T, B, 4, H)
    # layout, batch padded, stored bf16 (halves its HBM->VMEM bytes).
    xproj = jnp.einsum('bti,ghi->tbgh', x.astype(jnp.float32), w_ih_r) + b_r
    xproj = jnp.pad(xproj, ((0, 0), (0, BP - B), (0, 0), (0, 0)))
    xproj = xproj.reshape(T, BP, 4 * H).astype(jnp.bfloat16)       # (T, BP, 4H)

    # Recurrent weights (Hin, 4*Hout), bf16 for the MXU; no gate padding.
    whh = jnp.transpose(w_hh_r, (2, 0, 1)).reshape(H, 4 * H).astype(jnp.bfloat16)

    # FC head, lane-padded output width (zero padding keeps the math exact).
    wfc = jnp.pad(jnp.transpose(w_fc).astype(jnp.float32),
                  ((0, 0), (0, CP - C)))                           # (H, CP)
    bfc = jnp.pad(b_fc.reshape(1, C).astype(jnp.float32),
                  ((0, 0), (0, CP - C)))                           # (1, CP)

    in_specs = [
        pl.BlockSpec((Tt, BT, 4 * H), lambda b, t: (t, b, 0)),     # xproj chunk
        pl.BlockSpec((H, 4 * H), lambda b, t: (0, 0)),             # whh
        pl.BlockSpec((H, CP), lambda b, t: (0, 0)),                # wfc
        pl.BlockSpec((1, CP), lambda b, t: (0, 0)),                # bfc
    ]
    out_spec = pl.BlockSpec((BT, CP), lambda b, t: (b, 0))
    scratch = [pltpu.VMEM((BT, H), jnp.float32),                   # h carry
               pltpu.VMEM((BT, H), jnp.float32)]                   # c carry

    # VMEM budget (double-buffered blocks) + headroom; capped to v7x physical.
    blk_bytes = (Tt * BT * 4 * H * 2 + H * 4 * H * 2 + H * CP * 4 + CP * 4
                 + BT * CP * 4)
    vmem_need = 2 * blk_bytes + 2 * BT * H * 4
    vmem_limit = int(min(max(vmem_need + (4 << 20), 32 << 20), 64 << 20))

    cost = pl.CostEstimate(
        flops=2 * T * BP * H * 4 * H + 2 * BP * H * CP,
        transcendentals=T * BP * 5 * H,
        bytes_accessed=(xproj.size * 2 + whh.size * 2 + wfc.size * 4
                        + bfc.size * 4 + BP * CP * 4),
    )

    kernel = functools.partial(_lstm_kernel, t_chunk=Tt, hidden=H,
                               unroll=min(8, Tt))
    out_padded = pl.pallas_call(
        kernel,
        out_shape=jax.ShapeDtypeStruct((BP, CP), jnp.float32),
        grid=(nb, nt),
        in_specs=in_specs,
        out_specs=out_spec,
        scratch_shapes=scratch,
        compiler_params=pltpu.CompilerParams(
            dimension_semantics=("parallel", "arbitrary"),
            vmem_limit_bytes=vmem_limit),
        cost_estimate=cost,
    )(xproj, whh, wfc, bfc)
    return out_padded[:B, :C]


def lstm_reference(x, w_ih, w_hh, b_ih, b_hh, w_fc, b_fc):
    """Pure-JAX f32 reference matching torch.nn.LSTM + Linear semantics."""
    B, T, I = x.shape
    H = w_hh.shape[1]
    h = jnp.zeros((B, H), jnp.float32)
    c = jnp.zeros((B, H), jnp.float32)
    for t in range(T):
        gates = x[:, t, :] @ w_ih.T + h @ w_hh.T + b_ih + b_hh
        i_g = jax.nn.sigmoid(gates[:, 0 * H:1 * H])
        f_g = jax.nn.sigmoid(gates[:, 1 * H:2 * H])
        g_g = jnp.tanh(gates[:, 2 * H:3 * H])
        o_g = jax.nn.sigmoid(gates[:, 3 * H:4 * H])
        c = f_g * c + i_g * g_g
        h = o_g * jnp.tanh(c)
    return h @ w_fc.T + b_fc


def init_params(key, input_size, hidden_size, num_classes):
    """Deterministic init mirroring PyTorch default U(-1/sqrt(H), 1/sqrt(H))."""
    k = 1.0 / jnp.sqrt(hidden_size)
    keys = jax.random.split(key, 6)
    w_ih = jax.random.uniform(keys[0], (4 * hidden_size, input_size),
                              jnp.float32, -k, k)
    w_hh = jax.random.uniform(keys[1], (4 * hidden_size, hidden_size),
                              jnp.float32, -k, k)
    b_ih = jax.random.uniform(keys[2], (4 * hidden_size,), jnp.float32, -k, k)
    b_hh = jax.random.uniform(keys[3], (4 * hidden_size,), jnp.float32, -k, k)
    w_fc = jax.random.uniform(keys[4], (num_classes, hidden_size),
                              jnp.float32, -k, k)
    b_fc = jax.random.uniform(keys[5], (num_classes,), jnp.float32, -k, k)
    return w_ih, w_hh, b_ih, b_hh, w_fc, b_fc


if __name__ == "__main__":
    key = jax.random.PRNGKey(0)
    k_param, k_x = jax.random.split(key)

    B, T = 2, 8  # small batch / sequence
    params = init_params(k_param, INPUT_SIZE, HIDDEN_SIZE, NUM_CLASSES)
    x = jax.random.normal(k_x, (B, T, INPUT_SIZE), jnp.float32)

    out = lstm_forward(x, *params)
    out = jax.block_until_ready(out)

    ref = lstm_reference(x, *params)
    assert out.shape == (B, NUM_CLASSES)
    # bf16 recurrent matmul + bf16 xproj (f32 accumulation) -> relaxed tol.
    assert jnp.allclose(out, ref, atol=2e-2, rtol=2e-2), (out, ref)

    print("KERNEL_OK")
</pallas_src>

<mosaic_0001>
module attributes {stable_mosaic.version = 11 : i64} {
  func.func @_lstm_kernel(%arg0: i32, %arg1: i32, %arg2: memref<8x8x256xbf16, #tpu.memory_space<vmem>>, %arg3: memref<64x256xbf16, #tpu.memory_space<vmem>>, %arg4: memref<64x128xf32, #tpu.memory_space<vmem>>, %arg5: memref<1x128xf32, #tpu.memory_space<vmem>>, %arg6: memref<8x128xf32, #tpu.memory_space<vmem>>, %arg7: memref<8x64xf32, #tpu.memory_space<vmem>>, %arg8: memref<8x64xf32, #tpu.memory_space<vmem>>) attributes {dimension_semantics = [#tpu.dimension_semantics<parallel>, #tpu.dimension_semantics<arbitrary>], iteration_bounds = array<i64: 1, 1>, scalar_prefetch = 0 : i64, scratch_operands = 2 : i64, tpu.core_type = #tpu.core_type<tc>, window_params = [{transform_indices = @transform_0, window_bounds = array<i64: 8, 8, 256>}, {pipeline_mode = #tpu.pipeline_mode<synchronous>, transform_indices = @transform_1, window_bounds = array<i64: 64, 256>}, {pipeline_mode = #tpu.pipeline_mode<synchronous>, transform_indices = @transform_2, window_bounds = array<i64: 64, 128>}, {pipeline_mode = #tpu.pipeline_mode<synchronous>, transform_indices = @transform_3, window_bounds = array<i64: 1, 128>}, {transform_indices = @transform_4, window_bounds = array<i64: 8, 128>}]} {
    %c0_i32 = arith.constant 0 : i32
    %0 = arith.cmpi eq, %arg1, %c0_i32 : i32
    %1 = arith.extui %0 : i1 to i32
    %c0_i32_0 = arith.constant 0 : i32
    %2 = arith.cmpi ne, %1, %c0_i32_0 : i32
    scf.if %2 {
      %cst_44 = arith.constant 0.000000e+00 : f32
      %195 = vector.broadcast %cst_44 : f32 to vector<8x64xf32>
      %c0_45 = arith.constant 0 : index
      %c0_46 = arith.constant 0 : index
      %196 = vector.load %arg7[%c0_45, %c0_46] : memref<8x64xf32, #tpu.memory_space<vmem>>, vector<8x64xf32>
      tpu.vector_store %arg7[%c0_45, %c0_46], %195 {strides = array<i32>} : memref<8x64xf32, #tpu.memory_space<vmem>>, vector<8x64xf32>,
      %cst_47 = arith.constant 0.000000e+00 : f32
      %197 = vector.broadcast %cst_47 : f32 to vector<8x64xf32>
      %c0_48 = arith.constant 0 : index
      %c0_49 = arith.constant 0 : index
      %198 = vector.load %arg8[%c0_48, %c0_49] : memref<8x64xf32, #tpu.memory_space<vmem>>, vector<8x64xf32>
      tpu.vector_store %arg8[%c0_48, %c0_49], %197 {strides = array<i32>} : memref<8x64xf32, #tpu.memory_space<vmem>>, vector<8x64xf32>,
    } else {
    }
    %c0 = arith.constant 0 : index
    %c0_1 = arith.constant 0 : index
    %3 = vector.load %arg3[%c0, %c0_1] : memref<64x256xbf16, #tpu.memory_space<vmem>>, vector<64x256xbf16>
    %c0_2 = arith.constant 0 : index
    %c0_3 = arith.constant 0 : index
    %4 = vector.load %arg7[%c0_2, %c0_3] : memref<8x64xf32, #tpu.memory_space<vmem>>, vector<8x64xf32>
    %c0_4 = arith.constant 0 : index
    %c0_5 = arith.constant 0 : index
    %5 = vector.load %arg8[%c0_4, %c0_5] : memref<8x64xf32, #tpu.memory_space<vmem>>, vector<8x64xf32>
    %c0_i32_6 = arith.constant 0 : i32
    %6 = arith.index_cast %c0_i32_6 : i32 to index
    %c0_7 = arith.constant 0 : index
    %c0_8 = arith.constant 0 : index
    %7 = vector.load %arg2[%6, %c0_7, %c0_8] : memref<8x8x256xbf16, #tpu.memory_space<vmem>>, vector<1x8x256xbf16>
    %8 = vector.shape_cast %7 : vector<1x8x256xbf16> to vector<8x256xbf16>
    %9 = arith.extf %8 : vector<8x256xbf16> to vector<8x256xf32>
    %10 = arith.truncf %4 : vector<8x64xf32> to vector<8x64xbf16>
    %cst = arith.constant dense<0.000000e+00> : vector<8x256xf32>
    %11 = tpu.matmul %10, %3, %cst {dimension_numbers = #tpu.dot_dimension_numbers<[1], [0], [0], [1], [0, 0, 1, 1], [], []>} : vector<8x64xbf16>, vector<64x256xbf16>, vector<8x256xf32> -> vector<8x256xf32>
    %12 = arith.addf %9, %11 : vector<8x256xf32>
    %13 = vector.extract_strided_slice %12 {offsets = [0, 0], sizes = [8, 192], strides = [1, 1]} : vector<8x256xf32> to vector<8x192xf32>
    %14 = arith.negf %13 : vector<8x192xf32>
    %15 = math.exp %14 : vector<8x192xf32>
    %cst_9 = arith.constant 1.000000e+00 : f32
    %16 = vector.broadcast %cst_9 : f32 to vector<8x192xf32>
    %17 = arith.addf %16, %15 : vector<8x192xf32>
    %18 = arith.divf %16, %17 : vector<8x192xf32>
    %19 = vector.extract_strided_slice %18 {offsets = [0, 0], sizes = [8, 64], strides = [1, 1]} : vector<8x192xf32> to vector<8x64xf32>
    %20 = vector.extract_strided_slice %18 {offsets = [0, 64], sizes = [8, 64], strides = [1, 1]} : vector<8x192xf32> to vector<8x64xf32>
    %21 = vector.extract_strided_slice %18 {offsets = [0, 128], sizes = [8, 64], strides = [1, 1]} : vector<8x192xf32> to vector<8x64xf32>
    %22 = vector.extract_strided_slice %12 {offsets = [0, 192], sizes = [8, 64], strides = [1, 1]} : vector<8x256xf32> to vector<8x64xf32>
    %23 = math.tanh %22 : vector<8x64xf32>
    %24 = arith.mulf %20, %5 : vector<8x64xf32>
    %25 = arith.mulf %19, %23 : vector<8x64xf32>
    %26 = arith.addf %24, %25 : vector<8x64xf32>
    %27 = math.tanh %26 : vector<8x64xf32>
    %28 = arith.mulf %21, %27 : vector<8x64xf32>
    %c1_i32 = arith.constant 1 : i32
    %29 = arith.index_cast %c1_i32 : i32 to index
    %c0_10 = arith.constant 0 : index
    %c0_11 = arith.constant 0 : index
    %30 = vector.load %arg2[%29, %c0_10, %c0_11] : memref<8x8x256xbf16, #tpu.memory_space<vmem>>, vector<1x8x256xbf16>
    %31 = vector.shape_cast %30 : vector<1x8x256xbf16> to vector<8x256xbf16>
    %32 = arith.extf %31 : vector<8x256xbf16> to vector<8x256xf32>
    %33 = arith.truncf %28 : vector<8x64xf32> to vector<8x64xbf16>
    %cst_12 = arith.constant dense<0.000000e+00> : vector<8x256xf32>
    %34 = tpu.matmul %33, %3, %cst_12 {dimension_numbers = #tpu.dot_dimension_numbers<[1], [0], [0], [1], [0, 0, 1, 1], [], []>} : vector<8x64xbf16>, vector<64x256xbf16>, vector<8x256xf32> -> vector<8x256xf32>
    %35 = arith.addf %32, %34 : vector<8x256xf32>
    %36 = vector.extract_strided_slice %35 {offsets = [0, 0], sizes = [8, 192], strides = [1, 1]} : vector<8x256xf32> to vector<8x192xf32>
    %37 = arith.negf %36 : vector<8x192xf32>
    %38 = math.exp %37 : vector<8x192xf32>
    %cst_13 = arith.constant 1.000000e+00 : f32
    %39 = vector.broadcast %cst_13 : f32 to vector<8x192xf32>
    %40 = arith.addf %39, %38 : vector<8x192xf32>
    %41 = arith.divf %39, %40 : vector<8x192xf32>
    %42 = vector.extract_strided_slice %41 {offsets = [0, 0], sizes = [8, 64], strides = [1, 1]} : vector<8x192xf32> to vector<8x64xf32>
    %43 = vector.extract_strided_slice %41 {offsets = [0, 64], sizes = [8, 64], strides = [1, 1]} : vector<8x192xf32> to vector<8x64xf32>
    %44 = vector.extract_strided_slice %41 {offsets = [0, 128], sizes = [8, 64], strides = [1, 1]} : vector<8x192xf32> to vector<8x64xf32>
    %45 = vector.extract_strided_slice %35 {offsets = [0, 192], sizes = [8, 64], strides = [1, 1]} : vector<8x256xf32> to vector<8x64xf32>
    %46 = math.tanh %45 : vector<8x64xf32>
    %47 = arith.mulf %43, %26 : vector<8x64xf32>
    %48 = arith.mulf %42, %46 : vector<8x64xf32>
    %49 = arith.addf %47, %48 : vector<8x64xf32>
    %50 = math.tanh %49 : vector<8x64xf32>
    %51 = arith.mulf %44, %50 : vector<8x64xf32>
    %c2_i32 = arith.constant 2 : i32
    %52 = arith.index_cast %c2_i32 : i32 to index
    %c0_14 = arith.constant 0 : index
    %c0_15 = arith.constant 0 : index
    %53 = vector.load %arg2[%52, %c0_14, %c0_15] : memref<8x8x256xbf16, #tpu.memory_space<vmem>>, vector<1x8x256xbf16>
    %54 = vector.shape_cast %53 : vector<1x8x256xbf16> to vector<8x256xbf16>
    %55 = arith.extf %54 : vector<8x256xbf16> to vector<8x256xf32>
    %56 = arith.truncf %51 : vector<8x64xf32> to vector<8x64xbf16>
    %cst_16 = arith.constant dense<0.000000e+00> : vector<8x256xf32>
    %57 = tpu.matmul %56, %3, %cst_16 {dimension_numbers = #tpu.dot_dimension_numbers<[1], [0], [0], [1], [0, 0, 1, 1], [], []>} : vector<8x64xbf16>, vector<64x256xbf16>, vector<8x256xf32> -> vector<8x256xf32>
    %58 = arith.addf %55, %57 : vector<8x256xf32>
    %59 = vector.extract_strided_slice %58 {offsets = [0, 0], sizes = [8, 192], strides = [1, 1]} : vector<8x256xf32> to vector<8x192xf32>
    %60 = arith.negf %59 : vector<8x192xf32>
    %61 = math.exp %60 : vector<8x192xf32>
    %cst_17 = arith.constant 1.000000e+00 : f32
    %62 = vector.broadcast %cst_17 : f32 to vector<8x192xf32>
    %63 = arith.addf %62, %61 : vector<8x192xf32>
    %64 = arith.divf %62, %63 : vector<8x192xf32>
    %65 = vector.extract_strided_slice %64 {offsets = [0, 0], sizes = [8, 64], strides = [1, 1]} : vector<8x192xf32> to vector<8x64xf32>
    %66 = vector.extract_strided_slice %64 {offsets = [0, 64], sizes = [8, 64], strides = [1, 1]} : vector<8x192xf32> to vector<8x64xf32>
    %67 = vector.extract_strided_slice %64 {offsets = [0, 128], sizes = [8, 64], strides = [1, 1]} : vector<8x192xf32> to vector<8x64xf32>
    %68 = vector.extract_strided_slice %58 {offsets = [0, 192], sizes = [8, 64], strides = [1, 1]} : vector<8x256xf32> to vector<8x64xf32>
    %69 = math.tanh %68 : vector<8x64xf32>
    %70 = arith.mulf %66, %49 : vector<8x64xf32>
    %71 = arith.mulf %65, %69 : vector<8x64xf32>
    %72 = arith.addf %70, %71 : vector<8x64xf32>
    %73 = math.tanh %72 : vector<8x64xf32>
    %74 = arith.mulf %67, %73 : vector<8x64xf32>
    %c3_i32 = arith.constant 3 : i32
    %75 = arith.index_cast %c3_i32 : i32 to index
    %c0_18 = arith.constant 0 : index
    %c0_19 = arith.constant 0 : index
    %76 = vector.load %arg2[%75, %c0_18, %c0_19] : memref<8x8x256xbf16, #tpu.memory_space<vmem>>, vector<1x8x256xbf16>
    %77 = vector.shape_cast %76 : vector<1x8x256xbf16> to vector<8x256xbf16>
    %78 = arith.extf %77 : vector<8x256xbf16> to vector<8x256xf32>
    %79 = arith.truncf %74 : vector<8x64xf32> to vector<8x64xbf16>
    %cst_20 = arith.constant dense<0.000000e+00> : vector<8x256xf32>
    %80 = tpu.matmul %79, %3, %cst_20 {dimension_numbers = #tpu.dot_dimension_numbers<[1], [0], [0], [1], [0, 0, 1, 1], [], []>} : vector<8x64xbf16>, vector<64x256xbf16>, vector<8x256xf32> -> vector<8x256xf32>
    %81 = arith.addf %78, %80 : vector<8x256xf32>
    %82 = vector.extract_strided_slice %81 {offsets = [0, 0], sizes = [8, 192], strides = [1, 1]} : vector<8x256xf32> to vector<8x192xf32>
    %83 = arith.negf %82 : vector<8x192xf32>
    %84 = math.exp %83 : vector<8x192xf32>
    %cst_21 = arith.constant 1.000000e+00 : f32
    %85 = vector.broadcast %cst_21 : f32 to vector<8x192xf32>
    %86 = arith.addf %85, %84 : vector<8x192xf32>
    %87 = arith.divf %85, %86 : vector<8x192xf32>
    %88 = vector.extract_strided_slice %87 {offsets = [0, 0], sizes = [8, 64], strides = [1, 1]} : vector<8x192xf32> to vector<8x64xf32>
    %89 = vector.extract_strided_slice %87 {offsets = [0, 64], sizes = [8, 64], strides = [1, 1]} : vector<8x192xf32> to vector<8x64xf32>
    %90 = vector.extract_strided_slice %87 {offsets = [0, 128], sizes = [8, 64], strides = [1, 1]} : vector<8x192xf32> to vector<8x64xf32>
    %91 = vector.extract_strided_slice %81 {offsets = [0, 192], sizes = [8, 64], strides = [1, 1]} : vector<8x256xf32> to vector<8x64xf32>
    %92 = math.tanh %91 : vector<8x64xf32>
    %93 = arith.mulf %89, %72 : vector<8x64xf32>
    %94 = arith.mulf %88, %92 : vector<8x64xf32>
    %95 = arith.addf %93, %94 : vector<8x64xf32>
    %96 = math.tanh %95 : vector<8x64xf32>
    %97 = arith.mulf %90, %96 : vector<8x64xf32>
    %c4_i32 = arith.constant 4 : i32
    %98 = arith.index_cast %c4_i32 : i32 to index
    %c0_22 = arith.constant 0 : index
    %c0_23 = arith.constant 0 : index
    %99 = vector.load %arg2[%98, %c0_22, %c0_23] : memref<8x8x256xbf16, #tpu.memory_space<vmem>>, vector<1x8x256xbf16>
    %100 = vector.shape_cast %99 : vector<1x8x256xbf16> to vector<8x256xbf16>
    %101 = arith.extf %100 : vector<8x256xbf16> to vector<8x256xf32>
    %102 = arith.truncf %97 : vector<8x64xf32> to vector<8x64xbf16>
    %cst_24 = arith.constant dense<0.000000e+00> : vector<8x256xf32>
    %103 = tpu.matmul %102, %3, %cst_24 {dimension_numbers = #tpu.dot_dimension_numbers<[1], [0], [0], [1], [0, 0, 1, 1], [], []>} : vector<8x64xbf16>, vector<64x256xbf16>, vector<8x256xf32> -> vector<8x256xf32>
    %104 = arith.addf %101, %103 : vector<8x256xf32>
    %105 = vector.extract_strided_slice %104 {offsets = [0, 0], sizes = [8, 192], strides = [1, 1]} : vector<8x256xf32> to vector<8x192xf32>
    %106 = arith.negf %105 : vector<8x192xf32>
    %107 = math.exp %106 : vector<8x192xf32>
    %cst_25 = arith.constant 1.000000e+00 : f32
    %108 = vector.broadcast %cst_25 : f32 to vector<8x192xf32>
    %109 = arith.addf %108, %107 : vector<8x192xf32>
    %110 = arith.divf %108, %109 : vector<8x192xf32>
    %111 = vector.extract_strided_slice %110 {offsets = [0, 0], sizes = [8, 64], strides = [1, 1]} : vector<8x192xf32> to vector<8x64xf32>
    %112 = vector.extract_strided_slice %110 {offsets = [0, 64], sizes = [8, 64], strides = [1, 1]} : vector<8x192xf32> to vector<8x64xf32>
    %113 = vector.extract_strided_slice %110 {offsets = [0, 128], sizes = [8, 64], strides = [1, 1]} : vector<8x192xf32> to vector<8x64xf32>
    %114 = vector.extract_strided_slice %104 {offsets = [0, 192], sizes = [8, 64], strides = [1, 1]} : vector<8x256xf32> to vector<8x64xf32>
    %115 = math.tanh %114 : vector<8x64xf32>
    %116 = arith.mulf %112, %95 : vector<8x64xf32>
    %117 = arith.mulf %111, %115 : vector<8x64xf32>
    %118 = arith.addf %116, %117 : vector<8x64xf32>
    %119 = math.tanh %118 : vector<8x64xf32>
    %120 = arith.mulf %113, %119 : vector<8x64xf32>
    %c5_i32 = arith.constant 5 : i32
    %121 = arith.index_cast %c5_i32 : i32 to index
    %c0_26 = arith.constant 0 : index
    %c0_27 = arith.constant 0 : index
    %122 = vector.load %arg2[%121, %c0_26, %c0_27] : memref<8x8x256xbf16, #tpu.memory_space<vmem>>, vector<1x8x256xbf16>
    %123 = vector.shape_cast %122 : vector<1x8x256xbf16> to vector<8x256xbf16>
    %124 = arith.extf %123 : vector<8x256xbf16> to vector<8x256xf32>
    %125 = arith.truncf %120 : vector<8x64xf32> to vector<8x64xbf16>
    %cst_28 = arith.constant dense<0.000000e+00> : vector<8x256xf32>
    %126 = tpu.matmul %125, %3, %cst_28 {dimension_numbers = #tpu.dot_dimension_numbers<[1], [0], [0], [1], [0, 0, 1, 1], [], []>} : vector<8x64xbf16>, vector<64x256xbf16>, vector<8x256xf32> -> vector<8x256xf32>
    %127 = arith.addf %124, %126 : vector<8x256xf32>
    %128 = vector.extract_strided_slice %127 {offsets = [0, 0], sizes = [8, 192], strides = [1, 1]} : vector<8x256xf32> to vector<8x192xf32>
    %129 = arith.negf %128 : vector<8x192xf32>
    %130 = math.exp %129 : vector<8x192xf32>
    %cst_29 = arith.constant 1.000000e+00 : f32
    %131 = vector.broadcast %cst_29 : f32 to vector<8x192xf32>
    %132 = arith.addf %131, %130 : vector<8x192xf32>
    %133 = arith.divf %131, %132 : vector<8x192xf32>
    %134 = vector.extract_strided_slice %133 {offsets = [0, 0], sizes = [8, 64], strides = [1, 1]} : vector<8x192xf32> to vector<8x64xf32>
    %135 = vector.extract_strided_slice %133 {offsets = [0, 64], sizes = [8, 64], strides = [1, 1]} : vector<8x192xf32> to vector<8x64xf32>
    %136 = vector.extract_strided_slice %133 {offsets = [0, 128], sizes = [8, 64], strides = [1, 1]} : vector<8x192xf32> to vector<8x64xf32>
    %137 = vector.extract_strided_slice %127 {offsets = [0, 192], sizes = [8, 64], strides = [1, 1]} : vector<8x256xf32> to vector<8x64xf32>
    %138 = math.tanh %137 : vector<8x64xf32>
    %139 = arith.mulf %135, %118 : vector<8x64xf32>
    %140 = arith.mulf %134, %138 : vector<8x64xf32>
    %141 = arith.addf %139, %140 : vector<8x64xf32>
    %142 = math.tanh %141 : vector<8x64xf32>
    %143 = arith.mulf %136, %142 : vector<8x64xf32>
    %c6_i32 = arith.constant 6 : i32
    %144 = arith.index_cast %c6_i32 : i32 to index
    %c0_30 = arith.constant 0 : index
    %c0_31 = arith.constant 0 : index
    %145 = vector.load %arg2[%144, %c0_30, %c0_31] : memref<8x8x256xbf16, #tpu.memory_space<vmem>>, vector<1x8x256xbf16>
    %146 = vector.shape_cast %145 : vector<1x8x256xbf16> to vector<8x256xbf16>
    %147 = arith.extf %146 : vector<8x256xbf16> to vector<8x256xf32>
    %148 = arith.truncf %143 : vector<8x64xf32> to vector<8x64xbf16>
    %cst_32 = arith.constant dense<0.000000e+00> : vector<8x256xf32>
    %149 = tpu.matmul %148, %3, %cst_32 {dimension_numbers = #tpu.dot_dimension_numbers<[1], [0], [0], [1], [0, 0, 1, 1], [], []>} : vector<8x64xbf16>, vector<64x256xbf16>, vector<8x256xf32> -> vector<8x256xf32>
    %150 = arith.addf %147, %149 : vector<8x256xf32>
    %151 = vector.extract_strided_slice %150 {offsets = [0, 0], sizes = [8, 192], strides = [1, 1]} : vector<8x256xf32> to vector<8x192xf32>
    %152 = arith.negf %151 : vector<8x192xf32>
    %153 = math.exp %152 : vector<8x192xf32>
    %cst_33 = arith.constant 1.000000e+00 : f32
    %154 = vector.broadcast %cst_33 : f32 to vector<8x192xf32>
    %155 = arith.addf %154, %153 : vector<8x192xf32>
    %156 = arith.divf %154, %155 : vector<8x192xf32>
    %157 = vector.extract_strided_slice %156 {offsets = [0, 0], sizes = [8, 64], strides = [1, 1]} : vector<8x192xf32> to vector<8x64xf32>
    %158 = vector.extract_strided_slice %156 {offsets = [0, 64], sizes = [8, 64], strides = [1, 1]} : vector<8x192xf32> to vector<8x64xf32>
    %159 = vector.extract_strided_slice %156 {offsets = [0, 128], sizes = [8, 64], strides = [1, 1]} : vector<8x192xf32> to vector<8x64xf32>
    %160 = vector.extract_strided_slice %150 {offsets = [0, 192], sizes = [8, 64], strides = [1, 1]} : vector<8x256xf32> to vector<8x64xf32>
    %161 = math.tanh %160 : vector<8x64xf32>
    %162 = arith.mulf %158, %141 : vector<8x64xf32>
    %163 = arith.mulf %157, %161 : vector<8x64xf32>
    %164 = arith.addf %162, %163 : vector<8x64xf32>
    %165 = math.tanh %164 : vector<8x64xf32>
    %166 = arith.mulf %159, %165 : vector<8x64xf32>
    %c7_i32 = arith.constant 7 : i32
    %167 = arith.index_cast %c7_i32 : i32 to index
    %c0_34 = arith.constant 0 : index
    %c0_35 = arith.constant 0 : index
    %168 = vector.load %arg2[%167, %c0_34, %c0_35] : memref<8x8x256xbf16, #tpu.memory_space<vmem>>, vector<1x8x256xbf16>
    %169 = vector.shape_cast %168 : vector<1x8x256xbf16> to vector<8x256xbf16>
    %170 = arith.extf %169 : vector<8x256xbf16> to vector<8x256xf32>
    %171 = arith.truncf %166 : vector<8x64xf32> to vector<8x64xbf16>
    %cst_36 = arith.constant dense<0.000000e+00> : vector<8x256xf32>
    %172 = tpu.matmul %171, %3, %cst_36 {dimension_numbers = #tpu.dot_dimension_numbers<[1], [0], [0], [1], [0, 0, 1, 1], [], []>} : vector<8x64xbf16>, vector<64x256xbf16>, vector<8x256xf32> -> vector<8x256xf32>
    %173 = arith.addf %170, %172 : vector<8x256xf32>
    %174 = vector.extract_strided_slice %173 {offsets = [0, 0], sizes = [8, 192], strides = [1, 1]} : vector<8x256xf32> to vector<8x192xf32>
    %175 = arith.negf %174 : vector<8x192xf32>
    %176 = math.exp %175 : vector<8x192xf32>
    %cst_37 = arith.constant 1.000000e+00 : f32
    %177 = vector.broadcast %cst_37 : f32 to vector<8x192xf32>
    %178 = arith.addf %177, %176 : vector<8x192xf32>
    %179 = arith.divf %177, %178 : vector<8x192xf32>
    %180 = vector.extract_strided_slice %179 {offsets = [0, 0], sizes = [8, 64], strides = [1, 1]} : vector<8x192xf32> to vector<8x64xf32>
    %181 = vector.extract_strided_slice %179 {offsets = [0, 64], sizes = [8, 64], strides = [1, 1]} : vector<8x192xf32> to vector<8x64xf32>
    %182 = vector.extract_strided_slice %179 {offsets = [0, 128], sizes = [8, 64], strides = [1, 1]} : vector<8x192xf32> to vector<8x64xf32>
    %183 = vector.extract_strided_slice %173 {offsets = [0, 192], sizes = [8, 64], strides = [1, 1]} : vector<8x256xf32> to vector<8x64xf32>
    %184 = math.tanh %183 : vector<8x64xf32>
    %185 = arith.mulf %181, %164 : vector<8x64xf32>
    %186 = arith.mulf %180, %184 : vector<8x64xf32>
    %187 = arith.addf %185, %186 : vector<8x64xf32>
    %188 = math.tanh %187 : vector<8x64xf32>
    %189 = arith.mulf %182, %188 : vector<8x64xf32>
    %c8_i32 = arith.constant 8 : i32
    %c0_38 = arith.constant 0 : index
    %c0_39 = arith.constant 0 : index
    %190 = vector.load %arg7[%c0_38, %c0_39] : memref<8x64xf32, #tpu.memory_space<vmem>>, vector<8x64xf32>
    tpu.vector_store %arg7[%c0_38, %c0_39], %189 {strides = array<i32>} : memref<8x64xf32, #tpu.memory_space<vmem>>, vector<8x64xf32>,
    %c0_40 = arith.constant 0 : index
    %c0_41 = arith.constant 0 : index
    %191 = vector.load %arg8[%c0_40, %c0_41] : memref<8x64xf32, #tpu.memory_space<vmem>>, vector<8x64xf32>
    tpu.vector_store %arg8[%c0_40, %c0_41], %187 {strides = array<i32>} : memref<8x64xf32, #tpu.memory_space<vmem>>, vector<8x64xf32>,
    %c0_i32_42 = arith.constant 0 : i32
    %192 = arith.cmpi eq, %arg1, %c0_i32_42 : i32
    %193 = arith.extui %192 : i1 to i32
    %c0_i32_43 = arith.constant 0 : i32
    %194 = arith.cmpi ne, %193, %c0_i32_43 : i32
    scf.if %194 {
      %c0_44 = arith.constant 0 : index
      %c0_45 = arith.constant 0 : index
      %195 = vector.load %arg4[%c0_44, %c0_45] : memref<64x128xf32, #tpu.memory_space<vmem>>, vector<64x128xf32>
      %cst_46 = arith.constant dense<0.000000e+00> : vector<8x128xf32>
      %196 = tpu.matmul %189, %195, %cst_46 {dimension_numbers = #tpu.dot_dimension_numbers<[1], [0], [0], [1], [0, 0, 1, 1], [], []>} : vector<8x64xf32>, vector<64x128xf32>, vector<8x128xf32> -> vector<8x128xf32>
      %c0_47 = arith.constant 0 : index
      %c0_48 = arith.constant 0 : index
      %197 = vector.load %arg5[%c0_47, %c0_48] : memref<1x128xf32, #tpu.memory_space<vmem>>, vector<1x128xf32>
      %198 = vector.broadcast %197 : vector<1x128xf32> to vector<8x128xf32>
      %199 = arith.addf %196, %198 : vector<8x128xf32>
      %c0_49 = arith.constant 0 : index
      %c0_50 = arith.constant 0 : index
      %200 = vector.load %arg6[%c0_49, %c0_50] : memref<8x128xf32, #tpu.memory_space<vmem>>, vector<8x128xf32>
      tpu.vector_store %arg6[%c0_49, %c0_50], %199 {strides = array<i32>} : memref<8x128xf32, #tpu.memory_space<vmem>>, vector<8x128xf32>,
    } else {
    }
    return
  }
  func.func @transform_0(%arg0: i32, %arg1: i32) -> (i32, i32, i32) {
    %c0_i32 = arith.constant 0 : i32
    %c0_i32_0 = arith.constant 0 : i32
    return %arg1, %arg0, %c0_i32 : i32, i32, i32
  }
  func.func @transform_1(%arg0: i32, %arg1: i32) -> (i32, i32) {
    %c0_i32 = arith.constant 0 : i32
    %c0_i32_0 = arith.constant 0 : i32
    %c0_i32_1 = arith.constant 0 : i32
    return %c0_i32, %c0_i32_0 : i32, i32
  }
  func.func @transform_2(%arg0: i32, %arg1: i32) -> (i32, i32) {
    %c0_i32 = arith.constant 0 : i32
    %c0_i32_0 = arith.constant 0 : i32
    %c0_i32_1 = arith.constant 0 : i32
    return %c0_i32, %c0_i32_0 : i32, i32
  }
  func.func @transform_3(%arg0: i32, %arg1: i32) -> (i32, i32) {
    %c0_i32 = arith.constant 0 : i32
    %c0_i32_0 = arith.constant 0 : i32
    %c0_i32_1 = arith.constant 0 : i32
    return %c0_i32, %c0_i32_0 : i32, i32
  }
  func.func @transform_4(%arg0: i32, %arg1: i32) -> (i32, i32) {
    %c0_i32 = arith.constant 0 : i32
    %c0_i32_0 = arith.constant 0 : i32
    return %arg0, %c0_i32 : i32, i32
  }
}

</mosaic_0001>

<bundles_post_ra>
// kernel: lstm_forward.1
= control target key start
LH: loop header
LB: loop body
LE: loop exit
PB: predicated region body
PF: predicated region fallthrough
CT: control target
= control target key end

     0   :  { %vm22_vm0 = vcmask 523264   ;;  %v1010_v1 = vmov 0   ;;  %v1011_v2 = vmov 0.0   ;;  %s1012_s6 = smov 64   ;;  %vm1013_vm1 = vmmov 0   ;;  %s1255_s1 = inlined_call_operand.vmem [shape: bf16[64,256], index: 1, kind: input, shape index: {}]   ;;  %s1256_s0 = inlined_call_operand.vmem [shape: bf16[8,8,256], index: 0, kind: input, shape index: {}]   ;;  %s1257_s2 = inlined_call_operand.vmem [shape: f32[64,128], index: 2, kind: input, shape index: {}]   ;;  %s1258_s3 = inlined_call_operand.vmem [shape: f32[1,128], index: 3, kind: input, shape index: {}]   ;;  %s1259_s4 = inlined_call_operand.vmem [shape: f32[8,128], index: 4, kind: output, shape index: {}]  }
   0x1   :  { %v1042_v0 = vld [vmem:[%s1255_s1 + $0x34] ss:$8 sps:$4 sm:$0xff]   ;;  %115 = vmatprep.mubr.bf16.mxu0 %v1010_v1  ;;  %23 = vst.msk [vmem:[#allocation2] sm:$0xff] %vm22_vm0, %v1011_v2  ;;  %24 = vst.msk [vmem:[#allocation3] sm:$0xff] %vm22_vm0, %v1011_v2  ;;  %200 = vmatprep.mubr.bf16.mxu1 %v1010_v1  ;;  %v1053_v3 = vld [vmem:[%s1255_s1 + $0x30] ss:$8 sps:$4 sm:$0xff]  }
   0x2   :  { %91 = vmatprep.subr.bf16.mxu0 %v1042_v0  ;;  %v1059_v4 = vld [vmem:[%s1255_s1 + $0x24] ss:$8 sps:$4 sm:$0xff]   ;;  %176 = vmatprep.subr.bf16.mxu1 %v1042_v0  ;;  %v1066_v5 = vld [vmem:[%s1255_s1 + $0x20] ss:$8 sps:$4 sm:$0xff]   ;;  %v1073_v6 = vld [vmem:[%s1255_s1 + $0x14] ss:$8 sps:$4 sm:$0xff]  }
   0x3   :  { %92 = vmatpush1.bf16.msra.mxu0 %v1053_v3  ;;  %177 = vmatpush1.bf16.msra.mxu1 %v1053_v3  ;;  %v1080_v7 = vld [vmem:[%s1255_s1 + $0x10] ss:$8 sps:$4 sm:$0xff]   ;;  %v1087_v8 = vld [vmem:[%s1255_s1 + $0x4] ss:$8 sps:$4 sm:$0xff]   ;;  %v1094_v9 = vld [vmem:[%s1255_s1] ss:$8 sps:$4 sm:$0xff]  }
   0x4   :  { %93 = vmatprep.subr.bf16.mxu0 %v1059_v4  ;;  %178 = vmatprep.subr.bf16.mxu1 %v1059_v4  ;;  %v35_v12 = vld [vmem:[%s1256_s0] sm:$0xff]  ;;  %v840_v41 = vld [vmem:[%s1256_s0 + $0x8] sm:$0xff] }
   0x5   :  { %v37_v13 = vunpack.c.h.bf16 %v35_v12  ;;  %v36_v21 = vunpack.c.l.bf16 %v35_v12  ;;  %v163_v42 = vunpack.c.h.bf16 %v840_v41  ;;  %v162_v49 = vunpack.c.l.bf16 %v840_v41  ;;  %v848_v41 = vld [vmem:[%s1256_s0 + $0x18] sm:$0xff] }
   0x7   :  { %94 = vmatpush1.bf16.msra.mxu0 %v1066_v5  ;;  %179 = vmatpush1.bf16.msra.mxu1 %v1066_v5 }
   0x8   :  { %95 = vmatprep.subr.bf16.mxu0 %v1073_v6  ;;  %180 = vmatprep.subr.bf16.mxu1 %v1073_v6  ;;  %v33_v10 = vld [vmem:[#allocation2] sm:$0xff]  ;;  %v34_v20 = vld [vmem:[#allocation3] sm:$0xff] }
   0x9   :  { %v38_v11 = vpack.c.bf16 %v33_v10, %v33_v10 }
   0xb   :  { %96 = vmatpush1.bf16.msra.mxu0 %v1080_v7  ;;  %181 = vmatpush1.bf16.msra.mxu1 %v1080_v7 }
   0xc   :  { %97 = vmatprep.subr.bf16.mxu0 %v1087_v8  ;;  %182 = vmatprep.subr.bf16.mxu1 %v1087_v8 }
   0xf   :  { %98 = vmatpush1.bf16.msra.mxu0 %v1094_v9  ;;  %183 = vmatpush1.bf16.msra.mxu1 %v1094_v9 }
  0x10   :  { %257 = vmatprep.subr.bf16.mxu0 %v1042_v0  ;;  %338 = vmatprep.subr.bf16.mxu1 %v1042_v0 }
  0x12   :  { %837 = vmatmul.mubr.msk.bf16.vlgmr.msra.gmra.mxu0 %vm22_vm0, %v38_v11 }
  0x13   :  { %258 = vmatpush1.bf16.msra.mxu0 %v1053_v3  ;;  %281 = vmatprep.mubr.bf16.mxu0 %v1010_v1 }
  0x14   :  { %259 = vmatprep.subr.bf16.mxu0 %v1059_v4 }
  0x17   :  { %260 = vmatpush1.bf16.msra.mxu0 %v1066_v5 }
  0x18   :  { %261 = vmatprep.subr.bf16.mxu0 %v1073_v6 }
  0x1b   :  { %262 = vmatpush1.bf16.msra.mxu0 %v1080_v7 }
  0x1c   :  { %263 = vmatprep.subr.bf16.mxu0 %v1087_v8 }
  0x1f   :  { %264 = vmatpush1.bf16.msra.mxu0 %v1094_v9 }
  0x20   :  { %419 = vmatprep.subr.bf16.mxu0 %v1042_v0 }
  0xd2   :  { %v117_v14 = vpop.f32.mrf.mxu0 }
  0xd3   :  { %v124_v22 = vadd.f32 %v117_v14, %v36_v21  ;;  %v844_v14 = vld [vmem:[%s1256_s0 + $0x10] sm:$0xff] }
  0xd4   :  { %v119_v15 = vpop.f32.mrf.mxu0 }
  0xd5   :  { %v125_v16 = vadd.f32 %v119_v15, %v37_v13  ;;  %v838_v23 = vmul.f32 -1.442695, %v124_v22  ;;  %v244_v15 = vunpack.c.h.bf16 %v844_v14  ;;  %v243_v22 = vunpack.c.l.bf16 %v844_v14 }
  0xd6   :  { %v121_v17 = vpop.f32.mrf.mxu0 }
  0xd7   :  { %914 = vtanh.f32 %v125_v16  ;;  %v839_v34 = vmul.f32 -1.442695, %v125_v16 }
  0xd8   :  { %v122_v18 = vpop.f32.mrf.mxu0  ;;  %916 = vpow2.f32 %v838_v23 }
  0xe4   :  { %v915_v19 = vpop.eup %914 }
  0xe5   :  { %145 = vrot.lane.b32.xlu0 %v915_v19, %s1012_s6  ;;  %v917_v24 = vpop.eup %916 }
  0xe6   :  { %v132_v25 = vadd.f32 1.0, %v917_v24 }
  0xe8   :  { %918 = vrcp.f32 %v132_v25 }
  0xe9   :  { %140 = vrot.lane.b32.xlu0 %v34_v20, %s1012_s6 }
  0xf5   :  { %v919_v26 = vpop.eup %918 }
 0x157   :  { %v146_v27 = vpop.permute.xlu0 %145 }
 0x158   :  { %v148_v28 = vmul.f32 %v919_v26, %v146_v27 }
 0x15a   :  { %150 = vrot.lane.b32.xlu1 %v148_v28, %s1012_s6 }
 0x15b   :  { %v141_v29 = vpop.permute.xlu0 %140 }
 0x15c   :  { %v143_v30 = vmul.f32 %v919_v26, %v141_v29 }
 0x1cc   :  { %v151_v31 = vpop.permute.xlu1 %150 }
 0x1cd   :  { %v153_v32 = vadd.f32 %v151_v31, %v143_v30 }
 0x1cf   :  { %920 = vtanh.f32 %v153_v32 }
 0x1d0   :  { %922 = vpow2.f32 %v839_v34 }
 0x1dc   :  { %v921_v33 = vpop.eup %920 }
 0x1dd   :  { %156 = vrot.lane.b32.xlu1 %v921_v33, %s1012_s6  ;;  %v923_v35 = vpop.eup %922 }
 0x1de   :  { %v133_v36 = vadd.f32 1.0, %v923_v35 }
 0x1e0   :  { %924 = vrcp.f32 %v133_v36 }
 0x1ed   :  { %v925_v37 = vpop.eup %924 }
 0x24f   :  { %v157_v38 = vpop.permute.xlu1 %156 }
 0x250   :  { %v159_v39 = vmul.f32 %v925_v37, %v157_v38 }
 0x252   :  { %v164_v40 = vpack.c.bf16 %v159_v39, %v159_v39 }
 0x254   :  { %841 = vmatmul.mubr.msk.bf16.vlgmr.msra.gmra.mxu1 %vm22_vm0, %v164_v40 }
 0x255   :  { %339 = vmatpush1.bf16.msra.mxu1 %v1053_v3  ;;  %362 = vmatprep.mubr.bf16.mxu1 %v1010_v1 }
 0x256   :  { %340 = vmatprep.subr.bf16.mxu1 %v1059_v4 }
 0x259   :  { %341 = vmatpush1.bf16.msra.mxu1 %v1066_v5 }
 0x25a   :  { %342 = vmatprep.subr.bf16.mxu1 %v1073_v6 }
 0x25d   :  { %343 = vmatpush1.bf16.msra.mxu1 %v1080_v7 }
 0x25e   :  { %344 = vmatprep.subr.bf16.mxu1 %v1087_v8 }
 0x261   :  { %345 = vmatpush1.bf16.msra.mxu1 %v1094_v9 }
 0x262   :  { %500 = vmatprep.subr.bf16.mxu1 %v1042_v0 }
 0x314   :  { %v202_v43 = vpop.f32.mrf.mxu1 }
 0x315   :  { %v209_v50 = vadd.f32 %v202_v43, %v162_v49  ;;  %v324_v49 = vunpack.c.l.bf16 %v848_v41 }
 0x316   :  { %v204_v44 = vpop.f32.mrf.mxu1 }
 0x317   :  { %v210_v45 = vadd.f32 %v204_v44, %v163_v42  ;;  %v842_v51 = vmul.f32 -1.442695, %v209_v50  ;;  %v325_v42 = vunpack.c.h.bf16 %v848_v41 }
 0x318   :  { %v206_v46 = vpop.f32.mrf.mxu1 }
 0x319   :  { %926 = vtanh.f32 %v210_v45  ;;  %v843_v61 = vmul.f32 -1.442695, %v210_v45 }
 0x31a   :  { %v207_v47 = vpop.f32.mrf.mxu1  ;;  %928 = vpow2.f32 %v842_v51 }
 0x326   :  { %v927_v48 = vpop.eup %926 }
 0x327   :  { %226 = vrot.lane.b32.xlu0 %v927_v48, %s1012_s6  ;;  %v929_v52 = vpop.eup %928 }
 0x328   :  { %v217_v53 = vadd.f32 1.0, %v929_v52 }
 0x32a   :  { %930 = vrcp.f32 %v217_v53 }
 0x337   :  { %v931_v54 = vpop.eup %930 }
 0x338   :  { %v224_v57 = vmul.f32 %v931_v54, %v153_v32 }
 0x399   :  { %v227_v55 = vpop.permute.xlu0 %226 }
 0x39a   :  { %v229_v56 = vmul.f32 %v931_v54, %v227_v55 }
 0x39c   :  { %231 = vrot.lane.b32.xlu1 %v229_v56, %s1012_s6 }
 0x40e   :  { %v232_v58 = vpop.permute.xlu1 %231 }
 0x40f   :  { %v234_v59 = vadd.f32 %v232_v58, %v224_v57 }
 0x411   :  { %932 = vtanh.f32 %v234_v59 }
 0x412   :  { %934 = vpow2.f32 %v843_v61 }
 0x41e   :  { %v933_v60 = vpop.eup %932 }
 0x41f   :  { %237 = vrot.lane.b32.xlu0 %v933_v60, %s1012_s6  ;;  %v935_v62 = vpop.eup %934 }
 0x420   :  { %v218_v63 = vadd.f32 1.0, %v935_v62 }
 0x422   :  { %936 = vrcp.f32 %v218_v63 }
 0x42f   :  { %v937_v10 = vpop.eup %936 }
 0x491   :  { %v238_v11 = vpop.permute.xlu0 %237 }
 0x492   :  { %v240_v12 = vmul.f32 %v937_v10, %v238_v11 }
 0x494   :  { %v245_v13 = vpack.c.bf16 %v240_v12, %v240_v12 }
 0x496   :  { %845 = vmatmul.mubr.msk.bf16.vlgmr.msra.gmra.mxu0 %vm22_vm0, %v245_v13  ;;  %v852_v13 = vld [vmem:[%s1256_s0 + $0x20] sm:$0xff] }
 0x497   :  { %420 = vmatpush1.bf16.msra.mxu0 %v1053_v3  ;;  %443 = vmatprep.mubr.bf16.mxu0 %v1010_v1  ;;  %v406_v14 = vunpack.c.h.bf16 %v852_v13 }
 0x498   :  { %421 = vmatprep.subr.bf16.mxu0 %v1059_v4 }
 0x49b   :  { %422 = vmatpush1.bf16.msra.mxu0 %v1066_v5 }
 0x49c   :  { %423 = vmatprep.subr.bf16.mxu0 %v1073_v6 }
 0x49f   :  { %424 = vmatpush1.bf16.msra.mxu0 %v1080_v7 }
 0x4a0   :  { %425 = vmatprep.subr.bf16.mxu0 %v1087_v8 }
 0x4a3   :  { %426 = vmatpush1.bf16.msra.mxu0 %v1094_v9 }
 0x4a4   :  { %581 = vmatprep.subr.bf16.mxu0 %v1042_v0 }
 0x556   :  { %v283_v16 = vpop.f32.mrf.mxu0 }
 0x557   :  { %v290_v23 = vadd.f32 %v283_v16, %v243_v22 }
 0x558   :  { %v285_v17 = vpop.f32.mrf.mxu0 }
 0x559   :  { %v291_v18 = vadd.f32 %v285_v17, %v244_v15  ;;  %v846_v24 = vmul.f32 -1.442695, %v290_v23 }
 0x55a   :  { %v287_v19 = vpop.f32.mrf.mxu0 }
 0x55b   :  { %938 = vtanh.f32 %v291_v18  ;;  %v847_v34 = vmul.f32 -1.442695, %v291_v18 }
 0x55c   :  { %v288_v20 = vpop.f32.mrf.mxu0  ;;  %940 = vpow2.f32 %v846_v24 }
 0x568   :  { %v939_v21 = vpop.eup %938 }
 0x569   :  { %307 = vrot.lane.b32.xlu1 %v939_v21, %s1012_s6  ;;  %v941_v25 = vpop.eup %940  ;;  %v405_v21 = vunpack.c.l.bf16 %v852_v13 }
 0x56a   :  { %v298_v26 = vadd.f32 1.0, %v941_v25 }
 0x56c   :  { %942 = vrcp.f32 %v298_v26 }
 0x579   :  { %v943_v27 = vpop.eup %942 }
 0x57a   :  { %v305_v30 = vmul.f32 %v943_v27, %v234_v59 }
 0x5db   :  { %v308_v28 = vpop.permute.xlu1 %307 }
 0x5dc   :  { %v310_v29 = vmul.f32 %v943_v27, %v308_v28 }
 0x5de   :  { %312 = vrot.lane.b32.xlu0 %v310_v29, %s1012_s6 }
 0x650   :  { %v313_v31 = vpop.permute.xlu0 %312 }
 0x651   :  { %v315_v32 = vadd.f32 %v313_v31, %v305_v30 }
 0x653   :  { %944 = vtanh.f32 %v315_v32 }
 0x654   :  { %946 = vpow2.f32 %v847_v34 }
 0x660   :  { %v945_v33 = vpop.eup %944 }
 0x661   :  { %318 = vrot.lane.b32.xlu1 %v945_v33, %s1012_s6  ;;  %v947_v35 = vpop.eup %946 }
 0x662   :  { %v299_v36 = vadd.f32 1.0, %v947_v35 }
 0x664   :  { %948 = vrcp.f32 %v299_v36 }
 0x671   :  { %v949_v37 = vpop.eup %948 }
 0x6d3   :  { %v319_v38 = vpop.permute.xlu1 %318 }
 0x6d4   :  { %v321_v39 = vmul.f32 %v949_v37, %v319_v38 }
 0x6d6   :  { %v326_v40 = vpack.c.bf16 %v321_v39, %v321_v39 }
 0x6d8   :  { %849 = vmatmul.mubr.msk.bf16.vlgmr.msra.gmra.mxu1 %vm22_vm0, %v326_v40  ;;  %v856_v40 = vld [vmem:[%s1256_s0 + $0x28] sm:$0xff] }
 0x6d9   :  { %501 = vmatpush1.bf16.msra.mxu1 %v1053_v3  ;;  %524 = vmatprep.mubr.bf16.mxu1 %v1010_v1  ;;  %v487_v41 = vunpack.c.h.bf16 %v856_v40 }
 0x6da   :  { %502 = vmatprep.subr.bf16.mxu1 %v1059_v4 }
 0x6dd   :  { %503 = vmatpush1.bf16.msra.mxu1 %v1066_v5 }
 0x6de   :  { %504 = vmatprep.subr.bf16.mxu1 %v1073_v6 }
 0x6e1   :  { %505 = vmatpush1.bf16.msra.mxu1 %v1080_v7 }
 0x6e2   :  { %506 = vmatprep.subr.bf16.mxu1 %v1087_v8 }
 0x6e5   :  { %507 = vmatpush1.bf16.msra.mxu1 %v1094_v9 }
 0x6e6   :  { %662 = vmatprep.subr.bf16.mxu1 %v1042_v0 }
 0x798   :  { %v364_v43 = vpop.f32.mrf.mxu1 }
 0x799   :  { %v371_v50 = vadd.f32 %v364_v43, %v324_v49 }
 0x79a   :  { %v366_v44 = vpop.f32.mrf.mxu1 }
 0x79b   :  { %v372_v45 = vadd.f32 %v366_v44, %v325_v42  ;;  %v850_v51 = vmul.f32 -1.442695, %v371_v50 }
 0x79c   :  { %v368_v46 = vpop.f32.mrf.mxu1 }
 0x79d   :  { %950 = vtanh.f32 %v372_v45  ;;  %v851_v60 = vmul.f32 -1.442695, %v372_v45 }
 0x79e   :  { %v369_v47 = vpop.f32.mrf.mxu1  ;;  %952 = vpow2.f32 %v850_v51 }
 0x7aa   :  { %v951_v48 = vpop.eup %950 }
 0x7ab   :  { %388 = vrot.lane.b32.xlu0 %v951_v48, %s1012_s6  ;;  %v953_v52 = vpop.eup %952 }
 0x7ac   :  { %v379_v0 = vadd.f32 1.0, %v953_v52 }
 0x7ae   :  { %954 = vrcp.f32 %v379_v0 }
 0x7bb   :  { %v955_v53 = vpop.eup %954 }
 0x7bc   :  { %v386_v56 = vmul.f32 %v955_v53, %v315_v32 }
 0x81d   :  { %v389_v54 = vpop.permute.xlu0 %388 }
 0x81e   :  { %v391_v55 = vmul.f32 %v955_v53, %v389_v54 }
 0x820   :  { %393 = vrot.lane.b32.xlu1 %v391_v55, %s1012_s6 }
 0x892   :  { %v394_v57 = vpop.permute.xlu1 %393 }
 0x893   :  { %v396_v58 = vadd.f32 %v394_v57, %v386_v56 }
 0x895   :  { %956 = vtanh.f32 %v396_v58 }
 0x896   :  { %958 = vpow2.f32 %v851_v60 }
 0x8a2   :  { %v957_v59 = vpop.eup %956 }
 0x8a3   :  { %399 = vrot.lane.b32.xlu0 %v957_v59, %s1012_s6  ;;  %v959_v61 = vpop.eup %958 }
 0x8a4   :  { %v380_v62 = vadd.f32 1.0, %v959_v61 }
 0x8a6   :  { %960 = vrcp.f32 %v380_v62 }
 0x8b3   :  { %v961_v63 = vpop.eup %960 }
 0x915   :  { %v400_v10 = vpop.permute.xlu0 %399 }
 0x916   :  { %v402_v11 = vmul.f32 %v961_v63, %v400_v10 }
 0x918   :  { %v407_v12 = vpack.c.bf16 %v402_v11, %v402_v11 }
 0x91a   :  { %853 = vmatmul.mubr.msk.bf16.vlgmr.msra.gmra.mxu0 %vm22_vm0, %v407_v12 }
 0x91b   :  { %582 = vmatpush1.bf16.msra.mxu0 %v1053_v3  ;;  %605 = vmatprep.mubr.bf16.mxu0 %v1010_v1 }
 0x91c   :  { %583 = vmatprep.subr.bf16.mxu0 %v1059_v4 }
 0x91f   :  { %584 = vmatpush1.bf16.msra.mxu0 %v1066_v5 }
 0x920   :  { %585 = vmatprep.subr.bf16.mxu0 %v1073_v6 }
 0x923   :  { %586 = vmatpush1.bf16.msra.mxu0 %v1080_v7 }
 0x924   :  { %587 = vmatprep.subr.bf16.mxu0 %v1087_v8 }
 0x927   :  { %588 = vmatpush1.bf16.msra.mxu0 %v1094_v9 }
 0x928   :  { %879 = vmatprep.subr.mxu0 %v1011_v2 }
 0x9da   :  { %v445_v15 = vpop.f32.mrf.mxu0 }
 0x9db   :  { %v452_v22 = vadd.f32 %v445_v15, %v405_v21 }
 0x9dc   :  { %v447_v16 = vpop.f32.mrf.mxu0 }
 0x9dd   :  { %v453_v17 = vadd.f32 %v447_v16, %v406_v14  ;;  %v854_v23 = vmul.f32 -1.442695, %v452_v22 }
 0x9de   :  { %v449_v18 = vpop.f32.mrf.mxu0 }
 0x9df   :  { %962 = vtanh.f32 %v453_v17  ;;  %v855_v33 = vmul.f32 -1.442695, %v453_v17 }
 0x9e0   :  { %v450_v19 = vpop.f32.mrf.mxu0  ;;  %964 = vpow2.f32 %v854_v23 }
 0x9ec   :  { %v963_v20 = vpop.eup %962 }
 0x9ed   :  { %469 = vrot.lane.b32.xlu1 %v963_v20, %s1012_s6  ;;  %v965_v24 = vpop.eup %964 }
 0x9ee   :  { %v460_v25 = vadd.f32 1.0, %v965_v24 }
 0x9f0   :  { %966 = vrcp.f32 %v460_v25 }
 0x9fd   :  { %v967_v26 = vpop.eup %966 }
 0x9fe   :  { %v467_v29 = vmul.f32 %v967_v26, %v396_v58  ;;  %v860_v58 = vld [vmem:[%s1256_s0 + $0x30] sm:$0xff] }
 0x9ff   :  { %v568_v59 = vunpack.c.h.bf16 %v860_v58  ;;  %v567_v12 = vunpack.c.l.bf16 %v860_v58 }
 0xa5f   :  { %v470_v27 = vpop.permute.xlu1 %469 }
 0xa60   :  { %v472_v28 = vmul.f32 %v967_v26, %v470_v27 }
 0xa62   :  { %474 = vrot.lane.b32.xlu0 %v472_v28, %s1012_s6 }
 0xad4   :  { %v475_v30 = vpop.permute.xlu0 %474 }
 0xad5   :  { %v477_v31 = vadd.f32 %v475_v30, %v467_v29 }
 0xad7   :  { %968 = vtanh.f32 %v477_v31 }
 0xad8   :  { %970 = vpow2.f32 %v855_v33 }
 0xae4   :  { %v969_v32 = vpop.eup %968 }
 0xae5   :  { %480 = vrot.lane.b32.xlu1 %v969_v32, %s1012_s6  ;;  %v971_v34 = vpop.eup %970 }
 0xae6   :  { %v461_v35 = vadd.f32 1.0, %v971_v34 }
 0xae8   :  { %972 = vrcp.f32 %v461_v35 }
 0xaf5   :  { %v973_v36 = vpop.eup %972 }
 0xb57   :  { %v481_v37 = vpop.permute.xlu1 %480 }
 0xb58   :  { %v483_v38 = vmul.f32 %v973_v36, %v481_v37 }
 0xb5a   :  { %v488_v39 = vpack.c.bf16 %v483_v38, %v483_v38 }
 0xb5c   :  { %857 = vmatmul.mubr.msk.bf16.vlgmr.msra.gmra.mxu1 %vm22_vm0, %v488_v39 }
 0xb5d   :  { %663 = vmatpush1.bf16.msra.mxu1 %v1053_v3  ;;  %686 = vmatprep.mubr.bf16.mxu1 %v1010_v1 }
 0xb5e   :  { %664 = vmatprep.subr.bf16.mxu1 %v1059_v4 }
 0xb61   :  { %665 = vmatpush1.bf16.msra.mxu1 %v1066_v5 }
 0xb62   :  { %666 = vmatprep.subr.bf16.mxu1 %v1073_v6  ;;  %v486_v6 = vunpack.c.l.bf16 %v856_v40 }
 0xb65   :  { %667 = vmatpush1.bf16.msra.mxu1 %v1080_v7 }
 0xb66   :  { %668 = vmatprep.subr.bf16.mxu1 %v1087_v8 }
 0xb69   :  { %669 = vmatpush1.bf16.msra.mxu1 %v1094_v9 }
 0xc1c   :  { %v526_v3 = vpop.f32.mrf.mxu1 }
 0xc1d   :  { %v533_v7 = vadd.f32 %v526_v3, %v486_v6  ;;  %v742_v6 = vld [vmem:[%s1257_s2 + $0x30] sm:$0xff] }
 0xc1e   :  { %v528_v42 = vpop.f32.mrf.mxu1 }
 0xc1f   :  { %v534_v1 = vadd.f32 %v528_v42, %v487_v41  ;;  %v858_v44 = vmul.f32 -1.442695, %v533_v7  ;;  %v741_v7 = vld [vmem:[%s1257_s2 + $0x28] sm:$0xff] }
 0xc20   :  { %v530_v43 = vpop.f32.mrf.mxu1 }
 0xc21   :  { %974 = vtanh.f32 %v534_v1  ;;  %v859_v52 = vmul.f32 -1.442695, %v534_v1 }
 0xc22   :  { %v531_v4 = vpop.f32.mrf.mxu1  ;;  %976 = vpow2.f32 %v858_v44  ;;  %v740_v44 = vld [vmem:[%s1257_s2 + $0x20] sm:$0xff] }
 0xc2e   :  { %v975_v5 = vpop.eup %974 }
 0xc2f   :  { %550 = vrot.lane.b32.xlu0 %v975_v5, %s1012_s6  ;;  %v977_v8 = vpop.eup %976  ;;  %v743_v5 = vld [vmem:[%s1257_s2 + $0x38] sm:$0xff] }
 0xc30   :  { %v541_v9 = vadd.f32 1.0, %v977_v8  ;;  %v739_v8 = vld [vmem:[%s1257_s2 + $0x18] sm:$0xff] }
 0xc32   :  { %978 = vrcp.f32 %v541_v9  ;;  %v738_v9 = vld [vmem:[%s1257_s2 + $0x10] sm:$0xff] }
 0xc3f   :  { %v979_v45 = vpop.eup %978 }
 0xc40   :  { %v548_v48 = vmul.f32 %v979_v45, %v477_v31  ;;  %v864_v31 = vld [vmem:[%s1256_s0 + $0x38] sm:$0xff] }
 0xc41   :  { %v649_v32 = vunpack.c.h.bf16 %v864_v31  ;;  %v648_v39 = vunpack.c.l.bf16 %v864_v31 }
 0xca1   :  { %v551_v46 = vpop.permute.xlu0 %550 }
 0xca2   :  { %v553_v47 = vmul.f32 %v979_v45, %v551_v46 }
 0xca4   :  { %555 = vrot.lane.b32.xlu1 %v553_v47, %s1012_s6  ;;  %v737_v47 = vld [vmem:[%s1257_s2 + $0x8] sm:$0xff] }
 0xd16   :  { %v556_v49 = vpop.permute.xlu1 %555 }
 0xd17   :  { %v558_v50 = vadd.f32 %v556_v49, %v548_v48  ;;  %v736_v49 = vld [vmem:[%s1257_s2] sm:$0xff] }
 0xd19   :  { %980 = vtanh.f32 %v558_v50 }
 0xd1a   :  { %982 = vpow2.f32 %v859_v52 }
 0xd26   :  { %v981_v51 = vpop.eup %980 }
 0xd27   :  { %561 = vrot.lane.b32.xlu0 %v981_v51, %s1012_s6  ;;  %v983_v0 = vpop.eup %982 }
 0xd28   :  { %v542_v53 = vadd.f32 1.0, %v983_v0 }
 0xd2a   :  { %984 = vrcp.f32 %v542_v53 }
 0xd37   :  { %v985_v54 = vpop.eup %984 }
 0xd99   :  { %v562_v55 = vpop.permute.xlu0 %561 }
 0xd9a   :  { %v564_v56 = vmul.f32 %v985_v54, %v562_v55 }
 0xd9c   :  { %v569_v57 = vpack.c.bf16 %v564_v56, %v564_v56 }
 0xd9e   :  { %861 = vmatmul.mubr.msk.bf16.vlgmr.msra.gmra.mxu0 %vm22_vm0, %v569_v57 }
 0xd9f   :  { %880 = vmatpush3.msra.mxu0 %v743_v5  ;;  %895 = vmatprep.mubr.msk.f32.mxu0 %vm1013_vm1, %v1011_v2 }
 0xda0   :  { %881 = vmatprep.subr.mxu0 %v1011_v2 }
 0xda1   :  { %882 = vmatpush3.msra.mxu0 %v742_v6 }
 0xda2   :  { %883 = vmatprep.subr.mxu0 %v1011_v2 }
 0xda3   :  { %884 = vmatpush3.msra.mxu0 %v741_v7 }
 0xda4   :  { %885 = vmatprep.subr.mxu0 %v1011_v2 }
 0xda5   :  { %886 = vmatpush3.msra.mxu0 %v740_v44 }
 0xda6   :  { %887 = vmatprep.subr.mxu0 %v1011_v2 }
 0xda7   :  { %888 = vmatpush3.msra.mxu0 %v739_v8 }
 0xda8   :  { %889 = vmatprep.subr.mxu0 %v1011_v2 }
 0xda9   :  { %890 = vmatpush3.msra.mxu0 %v738_v9 }
 0xdaa   :  { %891 = vmatprep.subr.mxu0 %v1011_v2 }
 0xdab   :  { %892 = vmatpush3.msra.mxu0 %v737_v47 }
 0xdac   :  { %893 = vmatprep.subr.mxu0 %v1011_v2  ;;  %v868_v2 = vld [vmem:[%s1258_s3] ss:$0 sm:$0xff] }
 0xdad   :  { %894 = vmatpush3.msra.mxu0 %v736_v49 }
 0xe5e   :  { %v607_v60 = vpop.f32.mrf.mxu0 }
 0xe5f   :  { %v614_v13 = vadd.f32 %v607_v60, %v567_v12 }
 0xe60   :  { %v609_v61 = vpop.f32.mrf.mxu0 }
 0xe61   :  { %v615_v62 = vadd.f32 %v609_v61, %v568_v59  ;;  %v862_v14 = vmul.f32 -1.442695, %v614_v13 }
 0xe62   :  { %v611_v63 = vpop.f32.mrf.mxu0 }
 0xe63   :  { %986 = vtanh.f32 %v615_v62  ;;  %v863_v24 = vmul.f32 -1.442695, %v615_v62 }
 0xe64   :  { %v612_v10 = vpop.f32.mrf.mxu0  ;;  %988 = vpow2.f32 %v862_v14 }
 0xe70   :  { %v987_v11 = vpop.eup %986 }
 0xe71   :  { %631 = vrot.lane.b32.xlu1 %v987_v11, %s1012_s6  ;;  %v989_v15 = vpop.eup %988 }
 0xe72   :  { %v622_v16 = vadd.f32 1.0, %v989_v15 }
 0xe74   :  { %990 = vrcp.f32 %v622_v16 }
 0xe81   :  { %v991_v17 = vpop.eup %990 }
 0xe82   :  { %v629_v20 = vmul.f32 %v991_v17, %v558_v50 }
 0xee3   :  { %v632_v18 = vpop.permute.xlu1 %631 }
 0xee4   :  { %v634_v19 = vmul.f32 %v991_v17, %v632_v18 }
 0xee6   :  { %636 = vrot.lane.b32.xlu0 %v634_v19, %s1012_s6 }
 0xf58   :  { %v637_v21 = vpop.permute.xlu0 %636 }
 0xf59   :  { %v639_v22 = vadd.f32 %v637_v21, %v629_v20 }
 0xf5b   :  { %992 = vtanh.f32 %v639_v22 }
 0xf5c   :  { %994 = vpow2.f32 %v863_v24 }
 0xf68   :  { %v993_v23 = vpop.eup %992 }
 0xf69   :  { %642 = vrot.lane.b32.xlu1 %v993_v23, %s1012_s6  ;;  %v995_v25 = vpop.eup %994 }
 0xf6a   :  { %v623_v26 = vadd.f32 1.0, %v995_v25 }
 0xf6c   :  { %996 = vrcp.f32 %v623_v26 }
 0xf79   :  { %v997_v27 = vpop.eup %996 }
 0xfdb   :  { %v643_v28 = vpop.permute.xlu1 %642 }
 0xfdc   :  { %v645_v29 = vmul.f32 %v997_v27, %v643_v28 }
 0xfde   :  { %v650_v30 = vpack.c.bf16 %v645_v29, %v645_v29 }
 0xfe0   :  { %865 = vmatmul.mubr.msk.bf16.vlgmr.msra.gmra.mxu1 %vm22_vm0, %v650_v30 }
0x10a0   :  { %v688_v33 = vpop.f32.mrf.mxu1 }
0x10a1   :  { %v695_v40 = vadd.f32 %v688_v33, %v648_v39 }
0x10a2   :  { %v690_v34 = vpop.f32.mrf.mxu1 }
0x10a3   :  { %v696_v35 = vadd.f32 %v690_v34, %v649_v32  ;;  %v866_v41 = vmul.f32 -1.442695, %v695_v40 }
0x10a4   :  { %v692_v36 = vpop.f32.mrf.mxu1 }
0x10a5   :  { %998 = vtanh.f32 %v696_v35  ;;  %v867_v51 = vmul.f32 -1.442695, %v696_v35 }
0x10a6   :  { %v693_v37 = vpop.f32.mrf.mxu1  ;;  %1000 = vpow2.f32 %v866_v41 }
0x10b2   :  { %v999_v38 = vpop.eup %998 }
0x10b3   :  { %712 = vrot.lane.b32.xlu0 %v999_v38, %s1012_s6  ;;  %v1001_v3 = vpop.eup %1000 }
0x10b4   :  { %v703_v42 = vadd.f32 1.0, %v1001_v3 }
0x10b6   :  { %1002 = vrcp.f32 %v703_v42 }
0x10c3   :  { %v1003_v1 = vpop.eup %1002 }
0x10c4   :  { %v710_v45 = vmul.f32 %v1003_v1, %v639_v22 }
0x1125   :  { %v713_v43 = vpop.permute.xlu0 %712 }
0x1126   :  { %v715_v4 = vmul.f32 %v1003_v1, %v713_v43 }
0x1128   :  { %717 = vrot.lane.b32.xlu1 %v715_v4, %s1012_s6 }
0x119a   :  { %v718_v46 = vpop.permute.xlu1 %717 }
0x119b   :  { %v720_v48 = vadd.f32 %v718_v46, %v710_v45 }
0x119d   :  { %1004 = vtanh.f32 %v720_v48  ;;  %729 = vrot.lane.b32.xlu1 %v720_v48, %s1012_s6 }
0x119e   :  { %1006 = vpow2.f32 %v867_v51 }
0x11aa   :  { %v1005_v50 = vpop.eup %1004 }
0x11ab   :  { %723 = vrot.lane.b32.xlu0 %v1005_v50, %s1012_s6  ;;  %v1007_v52 = vpop.eup %1006 }
0x11ac   :  { %v704_v0 = vadd.f32 1.0, %v1007_v52 }
0x11ae   :  { %1008 = vrcp.f32 %v704_v0 }
0x11bb   :  { %v1009_v54 = vpop.eup %1008 }
0x120f   :  { %v730_v53 = vpop.permute.xlu1 %729 }
0x1210   :  { %732 = vst.msk [vmem:[#allocation3] sm:$0xff] %vm22_vm0, %v730_v53 }
0x121d   :  { %v724_v55 = vpop.permute.xlu0 %723 }
0x121e   :  { %v726_v56 = vmul.f32 %v1009_v54, %v724_v55 }
0x1220   :  { %727 = vst.msk [vmem:[#allocation2] sm:$0xff] %vm22_vm0, %v726_v56  ;;  %896 = vmatmul.mubr.msk.f32.vlgmr.msra.gmra.mxu0 %vm22_vm0, %v726_v56 }
0x12e0   :  { %v820_v57 = vpop.f32.mrf.mxu0 }
0x12e1   :  { %v821_v58 = vadd.f32 %v868_v2, %v820_v57 }
0x12e2   :  { %v897_v59 = vpop.f32.mrf.mxu0 }
0x12e3   :  { %824 = vst [vmem:[%s1259_s4] sm:$0xff] %v821_v58 }

</bundles_post_ra>
